<compile_context>
chip_gen: v7x
topology: tpu7x:2x2x1
jax: 0.10.0
libtpu: 0.0.40
codegen_flags: <defaults>
</compile_context>

<pallas_src>
import functools
import math

import jax
import jax.numpy as jnp
from jax import lax
from jax.experimental import pallas as pl
from jax.experimental.pallas import tpu as pltpu

HEADS = 2
HEAD_DIM = 2                 # embedding_dim(4) // heads(2)
EMB_DIM = HEADS * HEAD_DIM   # 4
QKV_DIM = 3 * EMB_DIM        # 12
LANE = 128


def _round_up(x, m):
    return (x + m - 1) // m * m


def _vmem_limit_bytes():
    """~75% of physical VMEM: 48 MiB on v7x (64 MiB), 96 MiB on v5e/v6e (128 MiB)."""
    try:
        cap = int(pltpu.get_tpu_info().vmem_capacity_bytes)
    except Exception:
        cap = 64 * 1024 * 1024   # conservative (v7x-sized) fallback
    return max(32 * 1024 * 1024, min(100 * 1024 * 1024, (cap * 3) // 4))


def _pack_gate_params(params, fdim):
    """Pack wqkv/bqkv/rel/wo/bo into one (8 + F, 12) f32 array (single tiny DMA).

    rows 0..2            : wqkv (3, 12)
    row  3               : bqkv (12,)
    row  4, lanes 0..3   : wo   (4,)
    row  5, lane  0      : bo
    rows 8..8+F-1, lane 0: rel  (F,)
    """
    rows = 8 + max(fdim, 1)
    pack = jnp.zeros((rows, QKV_DIM), jnp.float32)
    pack = pack.at[0:3, :].set(params["wqkv"].astype(jnp.float32))
    pack = pack.at[3, :].set(params["bqkv"].astype(jnp.float32))
    pack = pack.at[4, 0:EMB_DIM].set(params["wo"].reshape(EMB_DIM).astype(jnp.float32))
    pack = pack.at[5, 0].set(params["bo"].astype(jnp.float32)[0])
    pack = pack.at[8:8 + fdim, 0].set(params["rel"].reshape(fdim).astype(jnp.float32))
    return pack


# --------------------------------------------------------------------------------------
# Shared gate math: 2-head TemporalMHSA over the (avg, max, tab) 3-token axis + sigmoid.
# Runs once per batch element — free filler under the memory-bound streaming.
# --------------------------------------------------------------------------------------
def _mhsa_gate(avg_pool, max_pool, tab_emb, pack_ref, fdim):
    P = pack_ref[...]                            # tiny (8+F, 12) block, loaded once
    wqkv = P[0:3, :]                             # (3, 12)
    bqkv = P[3:4, :]                             # (1, 12)
    wo_row = P[4:5, 0:EMB_DIM]                   # (1, 4)
    bo = P[5:6, 0:1]                             # (1, 1)
    rel = P[8:8 + fdim, 0:1]                     # (F, 1)

    # cat([avg, max, tab], -1) @ Wqkv without a lane concat:
    #   cat @ W == avg*W[0] + max*W[1] + tab*W[2]   (broadcast outer products)
    qkv = (avg_pool * wqkv[0:1, :]
           + max_pool * wqkv[1:2, :]
           + tab_emb * wqkv[2:3, :]
           + bqkv)                               # (F, 12)

    inv_sqrt_dk = 1.0 / math.sqrt(HEAD_DIM)
    head_vals = []
    for h in range(HEADS):                       # statically unrolled (2 heads)
        base = h * 3 * HEAD_DIM
        q = qkv[:, base:base + HEAD_DIM]                               # (F, 2)
        k = qkv[:, base + HEAD_DIM:base + 2 * HEAD_DIM] + rel          # (F, 2)
        v = qkv[:, base + 2 * HEAD_DIM:base + 3 * HEAD_DIM]            # (F, 2)
        logits = jnp.dot(q, k.T, preferred_element_type=jnp.float32) * inv_sqrt_dk
        logits = logits - jnp.max(logits, axis=-1, keepdims=True)
        p = jnp.exp(logits)
        attn = p / jnp.sum(p, axis=-1, keepdims=True)                  # (F, F)
        head_vals.append(jnp.dot(attn, v, preferred_element_type=jnp.float32))

    # o_proj as VPU broadcast-multiply + lane reduce (avoids a padded tiny MXU dot).
    gate = (jnp.sum(head_vals[0] * wo_row[:, 0:HEAD_DIM], axis=-1, keepdims=True)
            + jnp.sum(head_vals[1] * wo_row[:, HEAD_DIM:EMB_DIM], axis=-1, keepdims=True)
            + bo)                                # (F, 1)
    return jax.nn.sigmoid(gate)


# --------------------------------------------------------------------------------------
# Fused single-pass kernel: pool + gate + apply from one resident (F, DHW) slab.
# --------------------------------------------------------------------------------------
def _fused_gate_kernel(x_ref, temb_ref, pack_ref, o_ref, *, dhw):
    x = x_ref[0].astype(jnp.float32)                                   # (F, DHW)
    avg_pool = jnp.sum(x, axis=-1, keepdims=True) * (1.0 / dhw)        # (F, 1)
    max_pool = jnp.max(x, axis=-1, keepdims=True)                      # (F, 1)
    scale = _mhsa_gate(avg_pool, max_pool, temb_ref[0], pack_ref, x.shape[0])
    o_ref[0] = (x * scale).astype(o_ref.dtype)


# --------------------------------------------------------------------------------------
# Two-pass path, pass 1: streaming sum/max reduction + gate on the last DHW tile.
# --------------------------------------------------------------------------------------
def _stats_gate_kernel(x_ref, temb_ref, pack_ref, scale_ref, sum_acc, max_acc,
                       *, dhw, dhw_tile, ragged):
    t = pl.program_id(1)
    last = pl.num_programs(1) - 1

    @pl.when(t == 0)
    def _init():
        sum_acc[...] = jnp.zeros(sum_acc.shape, sum_acc.dtype)
        max_acc[...] = jnp.full(max_acc.shape, -jnp.inf, max_acc.dtype)

    # One read of the tile feeds BOTH reductions (fused single streaming pass).
    x = x_ref[0].astype(jnp.float32)                                   # (F, dhw_tile)

    if ragged:
        # Full tiles take the unmasked fast path; only the single boundary tile pays the
        # iota/compare/select cost.  OOB lanes of a Pallas boundary block contain garbage,
        # so BOTH sum (0) and max (-inf) must be masked there.
        @pl.when(t < last)
        def _full_tile():
            sum_acc[...] += jnp.sum(x, axis=-1, keepdims=True)
            max_acc[...] = jnp.maximum(max_acc[...], jnp.max(x, axis=-1, keepdims=True))

        @pl.when(t == last)
        def _boundary_tile():
            col = t * dhw_tile + lax.broadcasted_iota(jnp.int32, x.shape, 1)
            valid = col < dhw
            sum_acc[...] += jnp.sum(jnp.where(valid, x, 0.0), axis=-1, keepdims=True)
            max_acc[...] = jnp.maximum(
                max_acc[...],
                jnp.max(jnp.where(valid, x, -jnp.inf), axis=-1, keepdims=True))
    else:
        sum_acc[...] += jnp.sum(x, axis=-1, keepdims=True)
        max_acc[...] = jnp.maximum(max_acc[...], jnp.max(x, axis=-1, keepdims=True))

    @pl.when(t == last)
    def _finalize():
        avg_pool = sum_acc[...] * (1.0 / dhw)
        scale_ref[0] = _mhsa_gate(avg_pool, max_acc[...], temb_ref[0], pack_ref,
                                  sum_acc.shape[0])


# --------------------------------------------------------------------------------------
# Two-pass path, pass 2: lane-dense elementwise gating (boundary OOB stores are dropped).
# --------------------------------------------------------------------------------------
def _apply_gate_kernel(x_ref, scale_ref, o_ref):
    o_ref[0] = (x_ref[0] * scale_ref[0]).astype(o_ref.dtype)


# --------------------------------------------------------------------------------------
# Wrapper
# --------------------------------------------------------------------------------------
def temporal_gate(x, tab, params, *, fused=None, tile_bytes=None, donate_x=False):
    """x: (B, F, D, H, W), tab: (B, tab_dim).  Returns x * sigmoid(TemporalMHSA(pool))."""
    B, Fdim, D, H, W = x.shape
    DHW = D * H * W
    itemsize = jnp.dtype(x.dtype).itemsize
    vmem_limit = _vmem_limit_bytes()

    # --- tab embedding MLP: O(B*F) flops, computed once — hoisted out of the hot path ---
    emb = jnp.maximum(tab @ params["w1"] + params["b1"], 0.0) @ params["w2"] + params["b2"]
    tab_emb = emb.reshape(B, Fdim, 1).astype(jnp.float32)              # (B, F, 1)

    pack = _pack_gate_params(params, Fdim)                             # (8+F, 12)
    x_flat = x.reshape(B, Fdim, DHW)                                   # no pad, no copy
    io_alias = {0: 0} if donate_x else {}

    slab_bytes = Fdim * DHW * itemsize
    if fused is None:
        fused = slab_bytes <= vmem_limit // 4    # 2 in + 2 out buffers of one batch slab

    trans = B * (2 * Fdim * Fdim + Fdim)         # softmax exps (2 heads) + sigmoid

    if fused:
        # ---- single pass: 2x-traffic floor (read x, write x*scale), one launch ---------
        cost = pl.CostEstimate(
            flops=int(3 * B * Fdim * DHW + 64 * B * Fdim),
            transcendentals=int(trans),
            bytes_accessed=int(2 * B * Fdim * DHW * itemsize + 2 * B * Fdim * itemsize))
        out = pl.pallas_call(
            functools.partial(_fused_gate_kernel, dhw=DHW),
            out_shape=jax.ShapeDtypeStruct((B, Fdim, DHW), x.dtype),
            grid=(B,),
            in_specs=[pl.BlockSpec((1, Fdim, DHW), lambda b: (b, 0, 0)),
                      pl.BlockSpec((1, Fdim, 1), lambda b: (b, 0, 0)),
                      pl.BlockSpec(pack.shape, lambda b: (0, 0))],
            out_specs=pl.BlockSpec((1, Fdim, DHW), lambda b: (b, 0, 0)),
            compiler_params=pltpu.CompilerParams(
                dimension_semantics=("parallel",),
                vmem_limit_bytes=vmem_limit),
            cost_estimate=cost,
            input_output_aliases=io_alias,
        )(x_flat, tab_emb, pack)
        return out.reshape(B, Fdim, D, H, W)

    # ---- two-pass streaming: lane-dense DHW tiles, ragged last tile handled in-kernel ---
    if tile_bytes is None:
        # pass-2 footprint is the binding one: 2 in + 2 out buffers of this tile.
        tile_bytes = max(2 * 1024 * 1024, min(16 * 1024 * 1024, vmem_limit // 6))
    lanes = max(LANE, (tile_bytes // (Fdim * itemsize)) // LANE * LANE)
    dhw_tile = min(lanes, _round_up(DHW, LANE))
    n_tiles = pl.cdiv(DHW, dhw_tile)
    ragged = (DHW % dhw_tile) != 0

    x_spec = pl.BlockSpec((1, Fdim, dhw_tile), lambda b, t: (b, 0, t))
    vec_spec = pl.BlockSpec((1, Fdim, 1), lambda b, t: (b, 0, 0))
    pack_spec = pl.BlockSpec(pack.shape, lambda b, t: (0, 0))

    # ---- pass 1: pooled stats + MHSA gate (reduction axis last, "arbitrary") -----------
    stats_cost = pl.CostEstimate(
        flops=int(2 * B * Fdim * DHW + 64 * B * Fdim),
        transcendentals=int(trans),
        bytes_accessed=int(B * Fdim * DHW * itemsize + 2 * B * Fdim * itemsize))
    scale = pl.pallas_call(
        functools.partial(_stats_gate_kernel, dhw=DHW, dhw_tile=dhw_tile, ragged=ragged),
        out_shape=jax.ShapeDtypeStruct((B, Fdim, 1), jnp.float32),
        grid=(B, n_tiles),
        in_specs=[x_spec, vec_spec, pack_spec],
        # Output block index constant across t -> block stays resident for the reduction.
        out_specs=vec_spec,
        scratch_shapes=[pltpu.VMEM((Fdim, 1), jnp.float32),    # running sum
                        pltpu.VMEM((Fdim, 1), jnp.float32)],   # running max
        compiler_params=pltpu.CompilerParams(
            dimension_semantics=("parallel", "arbitrary"),
            vmem_limit_bytes=vmem_limit),
        cost_estimate=stats_cost,
    )(x_flat, tab_emb, pack)

    # ---- pass 2: elementwise gating, fully parallel, lane-dense stores ------------------
    gate_cost = pl.CostEstimate(
        flops=int(B * Fdim * DHW),
        transcendentals=0,
        bytes_accessed=int(2 * B * Fdim * DHW * itemsize + B * Fdim * itemsize))
    out = pl.pallas_call(
        _apply_gate_kernel,
        out_shape=jax.ShapeDtypeStruct((B, Fdim, DHW), x.dtype),
        grid=(B, n_tiles),
        in_specs=[x_spec, vec_spec],
        out_specs=x_spec,
        compiler_params=pltpu.CompilerParams(
            dimension_semantics=("parallel", "parallel"),
            vmem_limit_bytes=vmem_limit),
        cost_estimate=gate_cost,
        input_output_aliases=io_alias,
    )(x_flat, scale)
    return out.reshape(B, Fdim, D, H, W)


# --------------------------------------------------------------------------------------
# Pure-JAX reference mirroring the PyTorch forward exactly.
# --------------------------------------------------------------------------------------
def temporal_gate_ref(x, tab, p):
    B, Fdim, D, H, W = x.shape
    xf = x.reshape(B, Fdim, -1)
    avg = xf.mean(-1, keepdims=True)                       # (B, F, 1)
    mx = xf.max(-1, keepdims=True)                         # (B, F, 1)
    emb = jnp.maximum(tab @ p["w1"] + p["b1"], 0.0) @ p["w2"] + p["b2"]   # (B, F)
    cat = jnp.concatenate([avg, mx, emb[..., None]], axis=-1)             # (B, F, 3)
    qkv = cat @ p["wqkv"] + p["bqkv"]                      # (B, F, 12)
    qkv = qkv.reshape(B, Fdim, HEADS, 3 * HEAD_DIM).transpose(0, 2, 1, 3)
    q, k, v = (qkv[..., 0:HEAD_DIM],
               qkv[..., HEAD_DIM:2 * HEAD_DIM],
               qkv[..., 2 * HEAD_DIM:3 * HEAD_DIM])
    k = k + p["rel"].reshape(1, 1, Fdim, 1)
    logits = jnp.einsum("bhqd,bhkd->bhqk", q, k) / math.sqrt(HEAD_DIM)
    attn = jax.nn.softmax(logits, axis=-1)
    vals = jnp.einsum("bhqk,bhkd->bhqd", attn, v)
    vals = vals.transpose(0, 2, 1, 3).reshape(B, Fdim, EMB_DIM)
    gate = jax.nn.sigmoid(vals @ p["wo"] + p["bo"])        # (B, F, 1)
    return x * gate[..., None, None]


if __name__ == "__main__":
    B, Fdim, D, H, W = 2, 8, 4, 16, 16        # gate_frames = 8
    TAB = 6                                   # tab_dim = 6
    F2 = Fdim // 2

    key = jax.random.PRNGKey(0)
    ks = jax.random.split(key, 13)
    params = {
        "w1":   jax.random.normal(ks[0], (TAB, F2), jnp.float32) * 0.3,
        "b1":   jax.random.normal(ks[1], (F2,), jnp.float32) * 0.1,
        "w2":   jax.random.normal(ks[2], (F2, Fdim), jnp.float32) * 0.3,
        "b2":   jax.random.normal(ks[3], (Fdim,), jnp.float32) * 0.1,
        "wqkv": jax.random.normal(ks[4], (3, 3 * EMB_DIM), jnp.float32) * 0.3,
        "bqkv": jax.random.normal(ks[5], (3 * EMB_DIM,), jnp.float32) * 0.1,
        "rel":  jax.random.normal(ks[6], (Fdim,), jnp.float32),
        "wo":   jax.random.normal(ks[7], (EMB_DIM, 1), jnp.float32) * 0.3,
        "bo":   jax.random.normal(ks[8], (1,), jnp.float32) * 0.1,
    }
    x = jax.random.normal(ks[9], (B, Fdim, D, H, W), jnp.float32)
    tab = jax.random.normal(ks[10], (B, TAB), jnp.float32)

    # Path 1: fused single-pass (per-batch slab fits VMEM) — the default at this shape.
    out = jax.block_until_ready(temporal_gate(x, tab, params))
    ref = temporal_gate_ref(x, tab, params)
    assert out.shape == ref.shape == x.shape
    assert jnp.allclose(out, ref, atol=1e-5, rtol=1e-5), (
        f"fused path max abs err = {jnp.max(jnp.abs(out - ref))}")

    # Path 2: two-pass streaming with a ragged last DHW tile (exercises boundary masking
    # and the no-pad / no-slice wrapper; DHW = 300 is not a multiple of 128).
    x2 = jax.random.normal(ks[11], (1, Fdim, 3, 10, 10), jnp.float32)
    tab2 = jax.random.normal(ks[12], (1, TAB), jnp.float32)
    out2 = jax.block_until_ready(
        temporal_gate(x2, tab2, params, fused=False, tile_bytes=4096))
    ref2 = temporal_gate_ref(x2, tab2, params)
    assert out2.shape == ref2.shape == x2.shape
    assert jnp.allclose(out2, ref2, atol=1e-5, rtol=1e-5), (
        f"two-pass path max abs err = {jnp.max(jnp.abs(out2 - ref2))}")

    print("KERNEL_OK")
</pallas_src>

<mosaic_0001>
module attributes {stable_mosaic.version = 11 : i64} {
  func.func @_fused_gate_kernel(%arg0: i32, %arg1: memref<1x8x1024xf32, #tpu.memory_space<vmem>>, %arg2: memref<1x8x1xf32, #tpu.memory_space<vmem>>, %arg3: memref<16x12xf32, #tpu.memory_space<vmem>>, %arg4: memref<1x8x1024xf32, #tpu.memory_space<vmem>>) attributes {dimension_semantics = [#tpu.dimension_semantics<parallel>], iteration_bounds = array<i64: 2>, scalar_prefetch = 0 : i64, scratch_operands = 0 : i64, tpu.core_type = #tpu.core_type<tc>, window_params = [{transform_indices = @transform_0, window_bounds = array<i64: 1, 8, 1024>}, {transform_indices = @transform_1, window_bounds = array<i64: 1, 8, 1>}, {pipeline_mode = #tpu.pipeline_mode<synchronous>, transform_indices = @transform_2, window_bounds = array<i64: 16, 12>}, {transform_indices = @transform_3, window_bounds = array<i64: 1, 8, 1024>}]} {
    %c0 = arith.constant 0 : index
    %c0_0 = arith.constant 0 : index
    %c0_1 = arith.constant 0 : index
    %0 = vector.load %arg1[%c0, %c0_0, %c0_1] : memref<1x8x1024xf32, #tpu.memory_space<vmem>>, vector<1x8x1024xf32>
    %1 = vector.shape_cast %0 : vector<1x8x1024xf32> to vector<8x1024xf32>
    %cst = arith.constant dense<0.000000e+00> : vector<8xf32>
    %2 = vector.multi_reduction <add>, %1, %cst [1] : vector<8x1024xf32> to vector<8xf32>
    %3 = vector.shape_cast %2 : vector<8xf32> to vector<8x1xf32>
    %cst_2 = arith.constant 9.765625E-4 : f32
    %4 = vector.broadcast %cst_2 : f32 to vector<8x1xf32>
    %5 = arith.mulf %3, %4 : vector<8x1xf32>
    %cst_3 = arith.constant dense<0xFF800000> : vector<8xf32>
    %6 = vector.multi_reduction <maximumf>, %1, %cst_3 [1] : vector<8x1024xf32> to vector<8xf32>
    %7 = vector.shape_cast %6 : vector<8xf32> to vector<8x1xf32>
    %c0_4 = arith.constant 0 : index
    %c0_5 = arith.constant 0 : index
    %c0_6 = arith.constant 0 : index
    %8 = vector.load %arg2[%c0_4, %c0_5, %c0_6] : memref<1x8x1xf32, #tpu.memory_space<vmem>>, vector<1x8x1xf32>
    %9 = vector.shape_cast %8 : vector<1x8x1xf32> to vector<8x1xf32>
    %c0_7 = arith.constant 0 : index
    %c0_8 = arith.constant 0 : index
    %10 = vector.load %arg3[%c0_7, %c0_8] : memref<16x12xf32, #tpu.memory_space<vmem>>, vector<16x12xf32>
    %11 = vector.extract_strided_slice %10 {offsets = [0, 0], sizes = [3, 12], strides = [1, 1]} : vector<16x12xf32> to vector<3x12xf32>
    %12 = vector.extract_strided_slice %10 {offsets = [3, 0], sizes = [1, 12], strides = [1, 1]} : vector<16x12xf32> to vector<1x12xf32>
    %13 = vector.extract_strided_slice %10 {offsets = [4, 0], sizes = [1, 4], strides = [1, 1]} : vector<16x12xf32> to vector<1x4xf32>
    %14 = vector.extract_strided_slice %10 {offsets = [5, 0], sizes = [1, 1], strides = [1, 1]} : vector<16x12xf32> to vector<1x1xf32>
    %15 = vector.extract_strided_slice %10 {offsets = [8, 0], sizes = [8, 1], strides = [1, 1]} : vector<16x12xf32> to vector<8x1xf32>
    %16 = vector.extract_strided_slice %11 {offsets = [0, 0], sizes = [1, 12], strides = [1, 1]} : vector<3x12xf32> to vector<1x12xf32>
    %17 = vector.broadcast %5 : vector<8x1xf32> to vector<8x12xf32>
    %18 = vector.broadcast %16 : vector<1x12xf32> to vector<8x12xf32>
    %19 = arith.mulf %17, %18 : vector<8x12xf32>
    %20 = vector.extract_strided_slice %11 {offsets = [1, 0], sizes = [1, 12], strides = [1, 1]} : vector<3x12xf32> to vector<1x12xf32>
    %21 = vector.broadcast %7 : vector<8x1xf32> to vector<8x12xf32>
    %22 = vector.broadcast %20 : vector<1x12xf32> to vector<8x12xf32>
    %23 = arith.mulf %21, %22 : vector<8x12xf32>
    %24 = arith.addf %19, %23 : vector<8x12xf32>
    %25 = vector.extract_strided_slice %11 {offsets = [2, 0], sizes = [1, 12], strides = [1, 1]} : vector<3x12xf32> to vector<1x12xf32>
    %26 = vector.broadcast %9 : vector<8x1xf32> to vector<8x12xf32>
    %27 = vector.broadcast %25 : vector<1x12xf32> to vector<8x12xf32>
    %28 = arith.mulf %26, %27 : vector<8x12xf32>
    %29 = arith.addf %24, %28 : vector<8x12xf32>
    %30 = vector.broadcast %12 : vector<1x12xf32> to vector<8x12xf32>
    %31 = arith.addf %29, %30 : vector<8x12xf32>
    %32 = vector.extract_strided_slice %31 {offsets = [0, 0], sizes = [8, 2], strides = [1, 1]} : vector<8x12xf32> to vector<8x2xf32>
    %33 = vector.extract_strided_slice %31 {offsets = [0, 2], sizes = [8, 2], strides = [1, 1]} : vector<8x12xf32> to vector<8x2xf32>
    %34 = vector.broadcast %15 : vector<8x1xf32> to vector<8x2xf32>
    %35 = arith.addf %33, %34 : vector<8x2xf32>
    %36 = vector.extract_strided_slice %31 {offsets = [0, 4], sizes = [8, 2], strides = [1, 1]} : vector<8x12xf32> to vector<8x2xf32>
    %37 = tpu.transpose %35, [1, 0] : vector<8x2xf32> -> vector<2x8xf32>
    %cst_9 = arith.constant dense<0.000000e+00> : vector<8x8xf32>
    %38 = tpu.matmul %32, %37, %cst_9 {dimension_numbers = #tpu.dot_dimension_numbers<[1], [0], [0], [1], [0, 0, 1, 1], [], []>} : vector<8x2xf32>, vector<2x8xf32>, vector<8x8xf32> -> vector<8x8xf32>
    %cst_10 = arith.constant 0.707106769 : f32
    %39 = vector.broadcast %cst_10 : f32 to vector<8x8xf32>
    %40 = arith.mulf %38, %39 : vector<8x8xf32>
    %cst_11 = arith.constant dense<0xFF800000> : vector<8xf32>
    %41 = vector.multi_reduction <maximumf>, %40, %cst_11 [1] : vector<8x8xf32> to vector<8xf32>
    %42 = vector.shape_cast %41 : vector<8xf32> to vector<8x1xf32>
    %43 = vector.broadcast %42 : vector<8x1xf32> to vector<8x8xf32>
    %44 = arith.subf %40, %43 : vector<8x8xf32>
    %45 = math.exp %44 : vector<8x8xf32>
    %cst_12 = arith.constant dense<0.000000e+00> : vector<8xf32>
    %46 = vector.multi_reduction <add>, %45, %cst_12 [1] : vector<8x8xf32> to vector<8xf32>
    %47 = vector.shape_cast %46 : vector<8xf32> to vector<8x1xf32>
    %48 = vector.broadcast %47 : vector<8x1xf32> to vector<8x8xf32>
    %49 = arith.divf %45, %48 : vector<8x8xf32>
    %cst_13 = arith.constant dense<0.000000e+00> : vector<8x2xf32>
    %50 = tpu.matmul %49, %36, %cst_13 {dimension_numbers = #tpu.dot_dimension_numbers<[1], [0], [0], [1], [0, 0, 1, 1], [], []>} : vector<8x8xf32>, vector<8x2xf32>, vector<8x2xf32> -> vector<8x2xf32>
    %51 = vector.extract_strided_slice %31 {offsets = [0, 6], sizes = [8, 2], strides = [1, 1]} : vector<8x12xf32> to vector<8x2xf32>
    %52 = vector.extract_strided_slice %31 {offsets = [0, 8], sizes = [8, 2], strides = [1, 1]} : vector<8x12xf32> to vector<8x2xf32>
    %53 = vector.broadcast %15 : vector<8x1xf32> to vector<8x2xf32>
    %54 = arith.addf %52, %53 : vector<8x2xf32>
    %55 = vector.extract_strided_slice %31 {offsets = [0, 10], sizes = [8, 2], strides = [1, 1]} : vector<8x12xf32> to vector<8x2xf32>
    %56 = tpu.transpose %54, [1, 0] : vector<8x2xf32> -> vector<2x8xf32>
    %cst_14 = arith.constant dense<0.000000e+00> : vector<8x8xf32>
    %57 = tpu.matmul %51, %56, %cst_14 {dimension_numbers = #tpu.dot_dimension_numbers<[1], [0], [0], [1], [0, 0, 1, 1], [], []>} : vector<8x2xf32>, vector<2x8xf32>, vector<8x8xf32> -> vector<8x8xf32>
    %cst_15 = arith.constant 0.707106769 : f32
    %58 = vector.broadcast %cst_15 : f32 to vector<8x8xf32>
    %59 = arith.mulf %57, %58 : vector<8x8xf32>
    %cst_16 = arith.constant dense<0xFF800000> : vector<8xf32>
    %60 = vector.multi_reduction <maximumf>, %59, %cst_16 [1] : vector<8x8xf32> to vector<8xf32>
    %61 = vector.shape_cast %60 : vector<8xf32> to vector<8x1xf32>
    %62 = vector.broadcast %61 : vector<8x1xf32> to vector<8x8xf32>
    %63 = arith.subf %59, %62 : vector<8x8xf32>
    %64 = math.exp %63 : vector<8x8xf32>
    %cst_17 = arith.constant dense<0.000000e+00> : vector<8xf32>
    %65 = vector.multi_reduction <add>, %64, %cst_17 [1] : vector<8x8xf32> to vector<8xf32>
    %66 = vector.shape_cast %65 : vector<8xf32> to vector<8x1xf32>
    %67 = vector.broadcast %66 : vector<8x1xf32> to vector<8x8xf32>
    %68 = arith.divf %64, %67 : vector<8x8xf32>
    %cst_18 = arith.constant dense<0.000000e+00> : vector<8x2xf32>
    %69 = tpu.matmul %68, %55, %cst_18 {dimension_numbers = #tpu.dot_dimension_numbers<[1], [0], [0], [1], [0, 0, 1, 1], [], []>} : vector<8x8xf32>, vector<8x2xf32>, vector<8x2xf32> -> vector<8x2xf32>
    %70 = vector.extract_strided_slice %13 {offsets = [0, 0], sizes = [1, 2], strides = [1, 1]} : vector<1x4xf32> to vector<1x2xf32>
    %71 = vector.broadcast %70 : vector<1x2xf32> to vector<8x2xf32>
    %72 = arith.mulf %50, %71 : vector<8x2xf32>
    %cst_19 = arith.constant dense<0.000000e+00> : vector<8xf32>
    %73 = vector.multi_reduction <add>, %72, %cst_19 [1] : vector<8x2xf32> to vector<8xf32>
    %74 = vector.shape_cast %73 : vector<8xf32> to vector<8x1xf32>
    %75 = vector.extract_strided_slice %13 {offsets = [0, 2], sizes = [1, 2], strides = [1, 1]} : vector<1x4xf32> to vector<1x2xf32>
    %76 = vector.broadcast %75 : vector<1x2xf32> to vector<8x2xf32>
    %77 = arith.mulf %69, %76 : vector<8x2xf32>
    %cst_20 = arith.constant dense<0.000000e+00> : vector<8xf32>
    %78 = vector.multi_reduction <add>, %77, %cst_20 [1] : vector<8x2xf32> to vector<8xf32>
    %79 = vector.shape_cast %78 : vector<8xf32> to vector<8x1xf32>
    %80 = arith.addf %74, %79 : vector<8x1xf32>
    %81 = vector.broadcast %14 : vector<1x1xf32> to vector<8x1xf32>
    %82 = arith.addf %80, %81 : vector<8x1xf32>
    %83 = arith.negf %82 : vector<8x1xf32>
    %84 = math.exp %83 : vector<8x1xf32>
    %cst_21 = arith.constant 1.000000e+00 : f32
    %85 = vector.broadcast %cst_21 : f32 to vector<8x1xf32>
    %86 = arith.addf %85, %84 : vector<8x1xf32>
    %87 = arith.divf %85, %86 : vector<8x1xf32>
    %88 = vector.broadcast %87 : vector<8x1xf32> to vector<8x1024xf32>
    %89 = arith.mulf %1, %88 : vector<8x1024xf32>
    %c0_22 = arith.constant 0 : index
    %c0_23 = arith.constant 0 : index
    %c0_24 = arith.constant 0 : index
    %90 = vector.load %arg4[%c0_22, %c0_23, %c0_24] : memref<1x8x1024xf32, #tpu.memory_space<vmem>>, vector<1x8x1024xf32>
    %91 = vector.shape_cast %90 : vector<1x8x1024xf32> to vector<8x1024xf32>
    %92 = vector.shape_cast %89 : vector<8x1024xf32> to vector<1x8x1024xf32>
    tpu.vector_store %arg4[%c0_22, %c0_23, %c0_24], %92 {strides = array<i32>} : memref<1x8x1024xf32, #tpu.memory_space<vmem>>, vector<1x8x1024xf32>,
    return
  }
  func.func @transform_0(%arg0: i32) -> (i32, i32, i32) {
    %c0_i32 = arith.constant 0 : i32
    %c0_i32_0 = arith.constant 0 : i32
    %c0_i32_1 = arith.constant 0 : i32
    return %arg0, %c0_i32, %c0_i32_0 : i32, i32, i32
  }
  func.func @transform_1(%arg0: i32) -> (i32, i32, i32) {
    %c0_i32 = arith.constant 0 : i32
    %c0_i32_0 = arith.constant 0 : i32
    %c0_i32_1 = arith.constant 0 : i32
    return %arg0, %c0_i32, %c0_i32_0 : i32, i32, i32
  }
  func.func @transform_2(%arg0: i32) -> (i32, i32) {
    %c0_i32 = arith.constant 0 : i32
    %c0_i32_0 = arith.constant 0 : i32
    %c0_i32_1 = arith.constant 0 : i32
    return %c0_i32, %c0_i32_0 : i32, i32
  }
  func.func @transform_3(%arg0: i32) -> (i32, i32, i32) {
    %c0_i32 = arith.constant 0 : i32
    %c0_i32_0 = arith.constant 0 : i32
    %c0_i32_1 = arith.constant 0 : i32
    return %arg0, %c0_i32, %c0_i32_0 : i32, i32, i32
  }
}

</mosaic_0001>

<bundles_post_ra>
// kernel: tpu_custom_call.1
= control target key start
LH: loop header
LB: loop body
LE: loop exit
PB: predicated region body
PF: predicated region fallthrough
CT: control target
= control target key end

     0   :  { %8 = vsyncpa [#allocation3], 0  ;;  %s1253_s0 = inlined_call_operand.hbm [shape: f32[2,8,1024], index: 0, kind: input, shape index: {}]   ;;  %s1254_s1 = inlined_call_operand.vmem [shape: f32[2,8,1], index: 1, kind: input, shape index: {}]   ;;  %s1255_s2 = inlined_call_operand.vmem [shape: f32[16,12], index: 2, kind: input, shape index: {}]   ;;  %s1256_s3 = inlined_call_operand.hbm [shape: f32[2,8,1024], index: 3, kind: output, shape index: {}]  }
   0x1   :  { %10 = vsyncpa [#allocation3 + $0x1], 0 }
   0x2   :  { %11 = vsyncpa [#allocation4], 0 }
   0x3   :  { %13 = vsyncpa [#allocation4 + $0x1], 0  ;;  %s995_s12 = smov 0   ;;  %s997_s13 = smov 0  }
   0x4   :  { %s999_s14 = smov 0   ;;  %s1001_s15 = smov 0  }
   0x5 LB: > { %s1016_s16 = sadd.s32 4294967295, %s963_s15   ;;  %s747_s17 = sadd.s32 4294967294, %s963_s15   ;;  %s963_s15 = sphi %s1001_s15, %s1271_s15   ;;  %s959_s14 = sphi %s999_s14, %s1270_s14   ;;  %s955_s13 = sphi %s997_s13, %s1269_s13   ;;  %s951_s12 = sphi %s995_s12, %s1268_s12  }
   0x6   : > { %s1020_s18 = sadd.s32 1, %s963_s15   ;;  %s26_s19 = sadd.s32 1, %s959_s14 }
   0x7   : > { %s23_s20 = ssub.s32 %s963_s15, %s1020_s18  ;;  %p33_p0 = scmp.ne.s32.totalorder %s959_s14, %s955_s13 }
   0x8   : > { %p24_p1 = scmp.eq.s32.totalorder %s23_s20, 0  ;;  %p34_p2 = scmp.eq.s32.totalorder %s963_s15, 0 }
   0x9   : > { %p39_p3 = scmp.ne.s32.totalorder %s955_s13, %s951_s12  ;;  %p40_p4 = scmp.eq.s32.totalorder %s1016_s16, 0 }
   0xa   : > { %s1032_s21 = scalar_select %p24_p1, %s959_s14, %s26_s19  }
   0xb   : > { %p1034_p5 = por %p34_p2, %p33_p0  ;;  %p1038_p6 = por %p40_p4, %p39_p3 }
   0xc   : > { %p110_p7 = scmp.eq.s32.totalorder %s1016_s16, 1  ;;  %p116_p8 = scmp.eq.s32.totalorder %s747_s17, 1 }
   0xd   : > { %p811_p10 = scmp.lt.s32.totalorder %s963_s15, 2  ;;  %s139_s26 = sand.u32 1, %s959_s14  }
   0xe   : > { %p1045_p11 = por %p110_p7, %p33_p0  ;;  %p1049_p12 = por %p116_p8, %p39_p3 }
   0xf   : > { %s769_s27 = sshll.u32 %s963_s15, 10  ;;  %s750_s28 = sshll.u32 %s139_s26, 6 }
  0x10   : > { %s1260_s24 = scalar_select %p1045_p11, 1, 0 }
  0x11   : > { %s1261_s25 = scalar_select %p1049_p12, 1, 0 }
  0x12   : > { %s1058_s4 = scalar_lea.hbm %s1253_s0, %s769_s27  ;;  %s143_s5 = scalar_lea.vmem [#allocation2], %s750_s28 }
  0x13   : > { %s151_s6 = sshll.u32 %s143_s5, 4  ;;  %p1062_p13 = pnand %p811_p10, %p1034_p5  ;;  %s1066_s6 = int_to_ptr.vmem [resolvable:$true] %s151_s6 }
  0x14   : > { %s140_s8 = scalar_lea.sflag [#allocation3], %s139_s26  ;;  %s867_s9 = scalar_lea.hbm %s1058_s4, 1024 }
  0x15   : > { %p868_p2 = scmp.ne.s32.totalorder %s1058_s4, %s867_s9  ;;  %p869_p3 = pneg %p1062_p13 }
  0x16   : > { %s872_s17 = scalar_lea.hbm %s1253_s0, 2048  ;;  %p873_p5 = scmp.lt.u32.totalorder %s1058_s4, %s1253_s0 }
  0x17   : > { %p870_p4 = pnand %p869_p3, %p868_p2  ;;  %p874_p8 = scmp.lt.u32.totalorder %s872_s17, %s867_s9 }
  0x18   : > { %p876_p9 = scmp.lt.u32.totalorder %s867_s9, %s1058_s4 }
  0x19   : > { %p871_p7 = pneg %p870_p4  ;;  %p875_p10 = por %p874_p8, %p873_p5 }
  0x1b   : > { %p877_p0 = por %p876_p9, %p875_p10 }
  0x1d   : > { %p878_p1 = pnand %p877_p0, %p871_p7 }
  0x1f   : > { %881 = shalt.err (!%p878_p1)
}
  0x20   : > { %s882_s22 = scalar_lea.vmem %s1066_s6, 1024  ;;  %s965_s26 = smov [#allocation2]  }
  0x21   : > { %p883_p2 = scmp.ne.s32.totalorder %s1066_s6, %s882_s22  ;;  %s887_s27 = sshll.u32 %s965_s26, 4  ;;  %s888_s27 = int_to_ptr.vmem [resolvable:$false] %s887_s27 }
  0x22   : > { %s889_s28 = scalar_lea.vmem %s888_s27, 2048  ;;  %p890_p11 = scmp.lt.s32.totalorder %s1066_s6, %s888_s27 }
  0x23   : > { %p885_p4 = pnand %p883_p2, %p869_p3  ;;  %p891_p5 = scmp.lt.s32.totalorder %s889_s28, %s882_s22 }
  0x25   : > { %p886_p12 = pneg %p885_p4  ;;  %p892_p8 = por %p891_p5, %p890_p11 }
  0x27   : > { %p893_p9 = pnand %p892_p8, %p886_p12 }
  0x29   : > { %896 = shalt.err (!%p893_p9)
}
  0x2a   : > { %806 = dma.hbm_to_vmem [thread:$0]  (!%p1062_p13), %s1058_s4, 1024, %s1066_s6, %s140_s8  }
  0x2b   : > { %p1263_p0 = scmp.lt.s32.totalorder %s963_s15, 3  ;;  %p1264_p1 = scmp.ge.s32.totalorder %s963_s15, 1 }
  0x2d   : > { %p164_p3 = pnand %p1264_p1, %p1263_p0 }
  0x2e   : > { %s1100_s29 = sand.u32 (!%p164_p3), 1, %s955_s13  }
  0x2f   : > { %167 = sbr.rel (%p164_p3) target bundleno = 1938 (0x792), region = 32  ;;  %s754_s30 = sshll.u32 (!%p164_p3), %s1100_s29, 6 }
  0x30   : > { %s170_s5 = scalar_lea.sflag (!%p164_p3), [#allocation3], %s1100_s29  ;;  %s173_s7 = scalar_lea.vmem (!%p164_p3), [#allocation2], %s754_s30 }
  0x36   : > { %942 = dma.done.wait (%p1038_p6), %s170_s5, 1024  }
  0x37   : > { %944 = vsyncadd (%p1038_p6), %s170_s5, 4294966272  ;;  %p200_p11 = scmp.lt.s32.totalorder %s1016_s16, 1  ;;  %v966_v0 = vmov 0   ;;  %v1115_v1 = vld [vmem:[%s173_s7] sm:$0xff]  ;;  %v1117_v2 = vld [vmem:[%s173_s7 + $0x8] sm:$0xff]  ;;  %v967_v25 = vmov 0.0   ;;  %v234_v26 = vlaneseq }
  0x38   : > { %853 = vset.pattern.permute.xlu1 %v966_v0  ;;  %854 = vset.pattern.permute.xlu0 %v966_v0  ;;  %v1119_v3 = vld [vmem:[%s173_s7 + $0x10] sm:$0xff]  ;;  %v212_v4 = vadd.f32 %v1117_v2, %v1115_v1  ;;  %v1123_v5 = vld [vmem:[%s173_s7 + $0x18] sm:$0xff]  ;;  %v1126_v8 = vld [vmem:[%s173_s7 + $0x20] sm:$0xff]  ;;  %vm968_vm0 = vmmov 0   ;;  %s969_s20 = smov 126   ;;  %vm270_vm1 = vcmask 15360  }
  0x39   : > { %s201_s4 = scalar_select %p200_p11, %s1016_s16, 1  ;;  %v1128_v9 = vld [vmem:[%s173_s7 + $0x38] sm:$0xff]  ;;  %v233_v10 = vld [vmem:[%s1255_s2 + $0x8] sm:$0xff]  ;;  %v1136_v13 = vld [vmem:[%s173_s7 + $0x30] sm:$0xff]  ;;  %v222_v14 = vmax.f32 %v1115_v1, %v1126_v8  ;;  %779 = vmatprep.subr.mxu0 %v967_v25  ;;  %784 = vmatprep.subr.mxu1 %v967_v25  ;;  %v1152_v27 = vshrl.u32 %v234_v26, 7  ;;  %vm347_vm2 = vcmask 64512  }
  0x3a   : > { %v213_v7 = vadd.f32 %v212_v4, %v1119_v3  ;;  %v1134_v12 = vld [vmem:[%s173_s7 + $0x28] sm:$0xff]  ;;  %v225_v16 = vmax.f32 %v1123_v5, %v1128_v9  ;;  %v224_v18 = vmax.f32 %v1119_v3, %v1136_v13  ;;  %v1160_v31 = vld [vmem:[%s1255_s2] sm:$0xff]  ;;  %781 = vmatprep.mubr.msk.f32.mxu0 %vm968_vm0, %v967_v25  ;;  %786 = vmatprep.mubr.msk.f32.mxu1 %vm968_vm0, %v967_v25  ;;  %s970_s22 = smov 124   ;;  %s971_s26 = smov 122  }
  0x3b   : > { %s756_s6 = sshll.u32 %s201_s4, 3  ;;  %v223_v17 = vmax.f32 %v1117_v2, %v1134_v12  ;;  %v236_v28 = vsub.s32 0, %v1152_v27  ;;  %v252_v29 = vsub.s32 2, %v1152_v27  ;;  %v241_v30 = vsub.s32 1, %v1152_v27  ;;  %s972_s27 = smov 120  }
  0x3c   : > { %s203_s10 = scalar_lea.vmem %s1254_s1, %s756_s6  ;;  %v214_v11 = vadd.f32 %v213_v7, %v1123_v5  ;;  %v227_v22 = vmax.f32 %v224_v18, %v225_v16  ;;  %v258_v37 = vsub.s32 3, %v1152_v27  ;;  %s973_s28 = smov 118  }
  0x3d   : > { %v231_v6 = vld [vmem:[%s203_s10] sm:$0xff]  ;;  %v226_v21 = vmax.f32 %v222_v14, %v223_v17  ;;  %v237_v33 = vrot.slane %v1160_v31, %v236_v28  ;;  %v253_v35 = vrot.slane %v1160_v31, %v252_v29  ;;  %v242_v36 = vrot.slane %v1160_v31, %v241_v30  ;;  %s770_s5 = sshll.u32 %s1016_s16, 10  ;;  %s199_s7 = scalar_lea.vmem [#allocation5], %s754_s30 }
  0x3e   : > { %247 = vperm.xlu1 %853, %v231_v6   ;;  %v215_v15 = vadd.f32 %v214_v11, %v1126_v8  ;;  %v259_v43 = vrot.slane %v1160_v31, %v258_v37  ;;  %s665_s4 = sshll.u32 %s199_s7, 4  ;;  %s1209_s6 = scalar_lea.hbm %s1256_s3, %s770_s5  ;;  %s1211_s4 = int_to_ptr.vmem [resolvable:$true] %s665_s4 }
  0x3f   : > { %v228_v24 = vmax.f32 %v226_v21, %v227_v22  ;;  %s651_s8 = scalar_lea.sflag [#allocation4], %s1100_s29  ;;  %s897_s9 = scalar_lea.vmem %s1211_s4, 1024 }
  0x40   : > { %v216_v19 = vadd.f32 %v215_v15, %v1134_v12  ;;  %v603_v15 = vsub.s32 4, %v1152_v27  ;;  %p898_p6 = scmp.ne.s32.totalorder %s1211_s4, %s897_s9  ;;  %p1265_p12 = scmp.ne.s32.totalorder %s1260_s24, 0 }
  0x41   : > { %s974_s10 = smov [#allocation5]  }
  0x42   : > { %263 = vperm.xlu1 %853, %v233_v10   ;;  %v217_v20 = vadd.f32 %v216_v19, %v1136_v13  ;;  %v604_v16 = vrot.slane %v1160_v31, %v603_v15  ;;  %p899_p13 = pnand %p898_p6, %p1265_p12  ;;  %s901_s23 = sshll.u32 %s974_s10, 4  ;;  %s902_s23 = int_to_ptr.vmem [resolvable:$false] %s901_s23 }
  0x43   : > { %s903_s11 = scalar_lea.vmem %s902_s23, 2048  ;;  %p904_p10 = scmp.lt.s32.totalorder %s1211_s4, %s902_s23 }
  0x44   : > { %v218_v23 = vadd.f32 %v217_v20, %v1128_v9  ;;  %p900_p7 = pneg %p899_p13  ;;  %p905_p2 = scmp.lt.s32.totalorder %s903_s11, %s897_s9 }
  0x46   : > { %219 = vadd.xlane.f32.xlu0 %v218_v23  ;;  %p906_p4 = por %p905_p2, %p904_p10 }
  0x48   : > { %p907_p5 = pnand %p906_p4, %p900_p7 }
  0x4a   : > { %229 = vmax.xlane.f32.xlu0 %v228_v24 }
  0xbd   : > { %v248_v38 = vpop.permute.xlu1 %247 }
  0xbe   : > { %v254_v41 = vmul.f32 %v253_v35, %v248_v38  ;;  %v620_v35 = vsub.s32 5, %v1152_v27 }
  0xc1   : > { %v264_v47 = vpop.permute.xlu1 %263 }
  0xd3   : > { %v220_v32 = vpop.xlane.xlu0 %219 }
  0xd4   : > { %v221_v34 = vmul.f32 0.0009765625, %v220_v32 }
  0xd6   : > { %v238_v40 = vmul.f32 %v237_v33, %v221_v34 }
  0xd7   : > { %v230_v39 = vpop.xlane.xlu0 %229 }
  0xd8   : > { %v243_v42 = vmul.f32 %v242_v36, %v230_v39  ;;  %v621_v36 = vrot.slane %v1160_v31, %v620_v35 }
  0xda   : > { %v244_v44 = vadd.f32 %v243_v42, %v238_v40 }
  0xdc   : > { %v255_v45 = vadd.f32 %v254_v41, %v244_v44 }
  0xde   : > { %v260_v46 = vadd.f32 %v259_v43, %v255_v45 }
  0xe0   : > { %v266_v48 = vadd.f32 %v264_v47, %v260_v46 }
  0xe2   : > { %268 = vrot.lane.b32.xlu0 %v266_v48, %s969_s20 }
 0x154   : > { %v269_v49 = vpop.permute.xlu0 %268 }
 0x155   : > { %780 = vmatpush3.xpose.msk.msra.mxu0 %vm270_vm1, %v269_v49 }
 0x156   : > { %794 = vmatprep.subr.mxu0 %v967_v25 }
 0x158   : > { %782 = vmatmul.mubr.msk.f32.vlgmr.msra.gmra.mrb[0].mxu0 %vm270_vm1, %v260_v46 }
 0x159   : > { %796 = vmatprep.mubr.msk.f32.mxu0 %vm968_vm0, %v967_v25 }
 0x22b   : > { %v342_v50 = vpop.f32.mrb[0].mxu0 }
 0x22c   : > { %v346_v51 = vmul.f32 0.70710677, %v342_v50  ;;  %v783_v52 = vpop.f32.mrb[1].mxu0 }
 0x22e   : > { %v348_v53 = vsel %vm347_vm2, %v346_v51, -inf }
 0x22f   : > { %349 = vmax.xlane.f32.xlu1 %v348_v53 }
 0x240   : > { %359 = vrot.lane.b32.xlu1 %v260_v46, %s970_s22 }
 0x244   : > { %435 = vrot.lane.b32.xlu1 %v260_v46, %s971_s26 }
 0x2bc   : > { %v350_v54 = vpop.xlane.xlu1 %349 }
 0x2bd   : > { %v351_v55 = vsub.f32 %v346_v51, %v350_v54 }
 0x2bf   : > { %v352_v56 = vmul.f32 1.442695, %v351_v55 }
 0x2c0   : > { %v360_v57 = vpop.permute.xlu1 %359 }
 0x2c1   : > { %855 = vpow2.f32 %v352_v56  ;;  %785 = vmatpush3.msra.mxu1 %v360_v57 }
 0x2c2   : > { %789 = vmatprep.subr.mxu1 %v967_v25 }
 0x2c4   : > { %v436_v0 = vpop.permute.xlu1 %435 }
 0x2cb   : > { %v856_v58 = vpop.eup %855 }
 0x2cc   : > { %v354_v59 = vsel %vm347_vm2, %v856_v58, 0.0 }
 0x2cd   : > { %355 = vadd.xlane.f32.xlu0 %v354_v59 }
 0x2e3   : > { %437 = vrot.lane.b32.xlu0 %v266_v48, %s972_s27 }
 0x35a   : > { %v356_v60 = vpop.xlane.xlu0 %355 }
 0x35b   : > { %857 = vrcp.f32 %v356_v60 }
 0x35e   : > { %v438_v63 = vpop.permute.xlu0 %437 }
 0x365   : > { %v858_v61 = vpop.eup %857 }
 0x366   : > { %v358_v62 = vmul.f32 %v858_v61, %v856_v58 }
 0x368   : > { %787 = vmatmul.mubr.msk.f32.vlgmr.msra.gmra.mrb[0].mxu1 %vm347_vm2, %v358_v62 }
 0x369   : > { %790 = vmatpush3.xpose.msk.msra.mxu1 %vm270_vm1, %v438_v63  ;;  %791 = vmatprep.mubr.msk.f32.mxu1 %vm968_vm0, %v967_v25 }
 0x36c   : > { %792 = vmatmul.mubr.msk.f32.vlgmr.msra.gmra.mrb[2].mxu1 %vm270_vm1, %v436_v0 }
 0x43b   : > { %v431_v4 = vpop.f32.mrb[0].mxu1 }
 0x43c   : > { %v788_v6 = vpop.f32.mrb[1].mxu1  ;;  %v605_v17 = vmul.f32 %v604_v16, %v431_v4 }
 0x43e   : > { %v606_v18 = vsel %vm270_vm1, %v605_v17, 0.0 }
 0x43f   : > { %v509_v7 = vpop.f32.mrb[2].mxu1 }
 0x440   : > { %v513_v10 = vmul.f32 0.70710677, %v509_v7  ;;  %v793_v11 = vpop.f32.mrb[3].mxu1 }
 0x442   : > { %v514_v14 = vsel %vm347_vm2, %v513_v10, -inf }
 0x443   : > { %515 = vmax.xlane.f32.xlu1 %v514_v14 }
 0x454   : > { %525 = vrot.lane.b32.xlu1 %v260_v46, %s973_s28 }
 0x478   : > { %607 = vadd.xlane.f32.xlu1 %v606_v18 }
 0x4d0   : > { %v516_v19 = vpop.xlane.xlu1 %515 }
 0x4d1   : > { %v517_v20 = vsub.f32 %v513_v10, %v516_v19 }
 0x4d3   : > { %v518_v21 = vmul.f32 1.442695, %v517_v20 }
 0x4d4   : > { %v526_v22 = vpop.permute.xlu1 %525 }
 0x4d5   : > { %859 = vpow2.f32 %v518_v21  ;;  %795 = vmatpush3.msra.mxu0 %v526_v22 }
 0x4df   : > { %v860_v23 = vpop.eup %859 }
 0x4e0   : > { %v520_v24 = vsel %vm347_vm2, %v860_v23, 0.0 }
 0x4e1   : > { %521 = vadd.xlane.f32.xlu0 %v520_v24 }
 0x4f7   : > { %610 = vrot.lane.b32.xlu0 %v604_v16, %s969_s20 }
 0x505   : > { %v608_v37 = vpop.xlane.xlu1 %607 }
 0x56e   : > { %v522_v25 = vpop.xlane.xlu0 %521 }
 0x56f   : > { %861 = vrcp.f32 %v522_v25 }
 0x572   : > { %v611_v29 = vpop.permute.xlu0 %610 }
 0x579   : > { %v862_v26 = vpop.eup %861 }
 0x57a   : > { %v524_v28 = vmul.f32 %v862_v26, %v860_v23 }
 0x57c   : > { %797 = vmatmul.mubr.msk.f32.vlgmr.msra.gmra.mrb[2].mxu0 %vm347_vm2, %v524_v28 }
 0x64f   : > { %v597_v30 = vpop.f32.mrb[2].mxu0 }
 0x650   : > { %v613_v32 = vmul.f32 %v611_v29, %v597_v30  ;;  %v798_v33 = vpop.f32.mrb[3].mxu0 }
 0x652   : > { %v614_v34 = vsel %vm270_vm1, %v613_v32, 0.0 }
 0x653   : > { %615 = vadd.xlane.f32.xlu0 %v614_v34 }
 0x6e0   : > { %v616_v38 = vpop.xlane.xlu0 %615 }
 0x6e1   : > { %v617_v39 = vadd.f32 %v616_v38, %v608_v37 }
 0x6e3   : > { %v622_v40 = vadd.f32 %v621_v36, %v617_v39 }
 0x6e5   : > { %v763_v41 = vmul.f32 -1.442695, %v622_v40 }
 0x6e7   : > { %863 = vpow2.f32 %v763_v41 }
 0x6f1   : > { %v864_v42 = vpop.eup %863 }
 0x6f2   : > { %v626_v43 = vadd.f32 1.0, %v864_v42 }
 0x6f4   : > { %865 = vrcp.f32 %v626_v43 }
 0x6fe   : > { %v866_v44 = vpop.eup %865 }
 0x6ff   : > { %631 = vperm.xlu1 %853, %v866_v44  }
 0x77e   : > { %v632_v45 = vpop.permute.xlu1 %631 }
 0x77f   : > { %v634_v27 = vmul.f32 %v632_v45, %v1115_v1  ;;  %v635_v31 = vmul.f32 %v632_v45, %v1117_v2  ;;  %v636_v46 = vmul.f32 %v632_v45, %v1119_v3  ;;  %v637_v47 = vmul.f32 %v632_v45, %v1123_v5 }
 0x780   : > { %v638_v48 = vmul.f32 %v632_v45, %v1126_v8  ;;  %v639_v49 = vmul.f32 %v632_v45, %v1134_v12  ;;  %v640_v50 = vmul.f32 %v632_v45, %v1136_v13  ;;  %v641_v51 = vmul.f32 %v632_v45, %v1128_v9 }
 0x781   : > { %642 = vst [vmem:[%s199_s7] sm:$0xff] %v634_v27  ;;  %643 = vst [vmem:[%s199_s7 + $0x8] sm:$0xff] %v635_v31 }
 0x782   : > { %644 = vst [vmem:[%s199_s7 + $0x10] sm:$0xff] %v636_v46  ;;  %645 = vst [vmem:[%s199_s7 + $0x18] sm:$0xff] %v637_v47 }
 0x783   : > { %646 = vst [vmem:[%s199_s7 + $0x20] sm:$0xff] %v638_v48  ;;  %647 = vst [vmem:[%s199_s7 + $0x28] sm:$0xff] %v639_v49 }
 0x784   : > { %648 = vst [vmem:[%s199_s7 + $0x30] sm:$0xff] %v640_v50  ;;  %649 = vst [vmem:[%s199_s7 + $0x38] sm:$0xff] %v641_v51 }
 0x785   : > { %910 = shalt.err (!%p907_p5)
}
 0x786   : > { %s911_s29 = scalar_lea.hbm %s1209_s6, 1024  ;;  %s915_s20 = scalar_lea.hbm %s1256_s3, 2048 }
 0x787   : > { %p912_p8 = scmp.ne.s32.totalorder %s1209_s6, %s911_s29  ;;  %p916_p1 = scmp.lt.u32.totalorder %s1209_s6, %s1256_s3 }
 0x788   : > { %p917_p3 = scmp.lt.u32.totalorder %s915_s20, %s911_s29  ;;  %p919_p6 = scmp.lt.u32.totalorder %s911_s29, %s1209_s6 }
 0x789   : > { %p913_p9 = pnand %p912_p8, %p1265_p12 }
 0x78a   : > { %p918_p11 = por %p917_p3, %p916_p1 }
 0x78b   : > { %p914_p0 = pneg %p913_p9 }
 0x78c   : > { %p920_p13 = por %p919_p6, %p918_p11 }
 0x78e   : > { %p921_p7 = pnand %p920_p13, %p914_p0 }
 0x790   : > { %924 = shalt.err (!%p921_p7)
}
 0x791   : > { %801 = dma.vmem_to_hbm [thread:$0]  (%p1265_p12), %s1211_s4, 1024, %s1209_s6, %s651_s8  }
 0x792 PF: > { %s677_s27 = sand.u32 1, %s951_s12   ;;  %p1266_p10 = scmp.ne.s32.totalorder %s1261_s25, 0 }
 0x793   : > { %p1267_p2 = scmp.ge.s32.totalorder %s963_s15, 2  ;;  %s678_s28 = scalar_lea.sflag [#allocation4], %s677_s27 }
 0x795   : > { %p808_p4 = pnand %p1267_p2, %p1266_p10 }
 0x797   : > { %946 = dma.done.wait (!%p808_p4), %s678_s28, 1024  }
 0x798   : > { %948 = vsyncadd (!%p808_p4), %s678_s28, 4294966272  ;;  %p16_p5 = scmp.ge.s32.totalorder %s1020_s18, 4   ;;  %s1268_s12 = smov %s955_s13 }
 0x799   : > { %s1269_s13 = smov %s959_s14  ;;  %s1270_s14 = smov %s1032_s21 }
 0x79a   : > { %s1271_s15 = smov %s1020_s18  ;;  %18 = sbr.rel (!%p16_p5) target bundleno = 5 (0x5), region = 80 }
 0x7a1   :  { %683 = vsyncpa [#allocation3], 1 }
 0x7a2   :  { %685 = vsyncpa [#allocation3 + $0x1], 1 }
 0x7a3   :  { %686 = vsyncpa [#allocation4], 1 }
 0x7a4   :  { %688 = vsyncpa [#allocation4 + $0x1], 1 }

</bundles_post_ra>
